<compile_context>
chip_gen: v5e
topology: v5e:2x2
jax: 0.10.0
libtpu: 0.0.40
codegen_flags: <defaults>
</compile_context>

<pallas_src>
import jax
import jax.numpy as jnp
from jax.experimental import pallas as pl
from jax.experimental.pallas import tpu as pltpu


def decoder_lstm_kernel(x_ref, h0_ref, c0_ref, wih_ref, whh_ref, b_ref,
                        out_ref, cn_ref, xw_ref):
    """Whole-sequence single-layer LSTM.

    x_ref:   (T*B, E)  time-major flattened embedded input
    h0_ref:  (B, H), c0_ref: (B, H)
    wih_ref: (E, 4H), whh_ref: (H, 4H), b_ref: (1, 4H)   (b = b_ih + b_hh)
    out_ref: (T, B, H) all hidden states (time-major)
    cn_ref:  (B, H) final cell state
    xw_ref:  (T*B, 4H) VMEM scratch for the hoisted input projection
    """
    T, B, H = out_ref.shape

    # --- Hoisted out of the recurrence: one well-shaped matmul + one bias
    # broadcast for all T steps (JAX does not CSE broadcast_in_dim per step).
    xw_ref[...] = (jnp.dot(x_ref[...], wih_ref[...],
                           preferred_element_type=jnp.float32)
                   + b_ref[...])

    whh = whh_ref[...]   # (H, 4H), stays resident in vregs across the loop
    # TODO(synk): for large H on v6e/v7x, cast MXU operands (whh / x) to bf16
    # while keeping preferred_element_type=f32; at H=32 the kernel is
    # latency-bound so f32 keeps exact parity with the reference.

    def step(t, carry):
        h, c = carry
        base = pl.multiple_of(t * B, B)
        # Serial critical path: only the hidden projection.
        gates = (xw_ref[pl.ds(base, B), :]
                 + jnp.dot(h, whh, preferred_element_type=jnp.float32))  # (B, 4H)
        # PyTorch gate order: i, f, g, o
        i_g = jax.nn.sigmoid(gates[:, 0 * H:1 * H])
        f_g = jax.nn.sigmoid(gates[:, 1 * H:2 * H])
        g_g = jnp.tanh(gates[:, 2 * H:3 * H])
        o_g = jax.nn.sigmoid(gates[:, 3 * H:4 * H])
        c_new = f_g * c + i_g * g_g
        h_new = o_g * jnp.tanh(c_new)
        # VMEM store into the resident output block; HBM writeback happens once
        # at the end of the (single) grid step.
        out_ref[t] = h_new.astype(out_ref.dtype)
        return (h_new, c_new)

    h0 = h0_ref[...].astype(jnp.float32)
    c0 = c0_ref[...].astype(jnp.float32)
    # Fully unrolled for small static T: gives the scheduler visibility so
    # MXU (h@W_hh), EUP (sigmoid/tanh) and VPU (gate elementwise) overlap
    # across time steps.
    _, c_fin = jax.lax.fori_loop(0, T, step, (h0, c0), unroll=True)
    cn_ref[...] = c_fin.astype(cn_ref.dtype)


def lstm_pallas(x_flat, h0, c0, w_ih_t, w_hh_t, bias, T, B):
    """x_flat: (T*B, E) f32 time-major; h0/c0: (B, H); w_ih_t: (E, 4H);
    w_hh_t: (H, 4H); bias: (1, 4H).  Returns (out (T,B,H), c_n (B,H))."""
    E = x_flat.shape[-1]
    H = h0.shape[-1]
    G = 4 * H

    grid_spec = pltpu.PrefetchScalarGridSpec(
        num_scalar_prefetch=0,
        grid=(1,),                                         # whole sequence in one shot
        in_specs=[
            pl.BlockSpec((T * B, E), lambda i: (0, 0)),    # embedded input (time-major)
            pl.BlockSpec((B, H), lambda i: (0, 0)),        # h0
            pl.BlockSpec((B, H), lambda i: (0, 0)),        # c0
            pl.BlockSpec((E, G), lambda i: (0, 0)),        # W_ih^T
            pl.BlockSpec((H, G), lambda i: (0, 0)),        # W_hh^T
            pl.BlockSpec((1, G), lambda i: (0, 0)),        # b_ih + b_hh
        ],
        out_specs=[
            pl.BlockSpec((T, B, H), lambda i: (0, 0, 0)),  # all hidden states
            pl.BlockSpec((B, H), lambda i: (0, 0)),        # c_n
        ],
        scratch_shapes=[
            pltpu.VMEM((T * B, G), jnp.float32),           # hoisted X@W_ih^T + b
        ],
    )

    out, c_n = pl.pallas_call(
        decoder_lstm_kernel,
        grid_spec=grid_spec,
        out_shape=(
            jax.ShapeDtypeStruct((T, B, H), jnp.float32),
            jax.ShapeDtypeStruct((B, H), jnp.float32),
        ),
        compiler_params=pltpu.CompilerParams(
            dimension_semantics=("arbitrary",)),           # single sequential step
    )(x_flat, h0, c0, w_ih_t, w_hh_t, bias)
    return out, c_n


class DecoderParams:
    """Deterministic parameter init matching nn.Embedding + nn.LSTM shapes."""

    def __init__(self, key, decoder_embedding_num, decoder_hidden_num, ch_corpus_num):
        k_emb, k_wih, k_whh, k_bih, k_bhh = jax.random.split(key, 5)
        E, H, V = decoder_embedding_num, decoder_hidden_num, ch_corpus_num
        # nn.Embedding: N(0, 1)
        self.embedding = jax.random.normal(k_emb, (V, E), jnp.float32)
        # nn.LSTM: U(-1/sqrt(H), 1/sqrt(H)); gate order i, f, g, o
        bound = 1.0 / jnp.sqrt(jnp.float32(H))
        self.w_ih = jax.random.uniform(k_wih, (4 * H, E), jnp.float32, -bound, bound)
        self.w_hh = jax.random.uniform(k_whh, (4 * H, H), jnp.float32, -bound, bound)
        self.b_ih = jax.random.uniform(k_bih, (4 * H,), jnp.float32, -bound, bound)
        self.b_hh = jax.random.uniform(k_bhh, (4 * H,), jnp.float32, -bound, bound)
        self.E, self.H, self.V = E, H, V


def decoder_forward(params, decoder_input, hidden):
    """decoder_input: (B, T) int32 token ids.
    hidden: tuple (h0, c0), each (1, B, H)  (PyTorch num_layers=1 convention).
    Returns (dec_out (B, T, H), (h_n (1,B,H), c_n (1,B,H)))."""
    h0, c0 = hidden
    B, T = decoder_input.shape
    # Glue: embedding gather in plain JAX, directly in time-major order so no
    # HBM-level transpose of the embedded sequence is needed.
    # TODO(synk): embedding gather could be moved in-kernel via scalar prefetch + pl.Element.
    emb_t = params.embedding[decoder_input.T].astype(jnp.float32)   # (T, B, E)
    x_flat = emb_t.reshape(T * B, params.E)                         # (T*B, E)

    w_ih_t = params.w_ih.T                                 # (E, 4H)
    w_hh_t = params.w_hh.T                                 # (H, 4H)
    bias = (params.b_ih + params.b_hh).reshape(1, -1)      # (1, 4H)

    out_tbh, c_n = lstm_pallas(x_flat, h0[0], c0[0], w_ih_t, w_hh_t, bias, T, B)
    dec_out = jnp.transpose(out_tbh, (1, 0, 2))            # (B, T, H) batch_first
    h_n = out_tbh[-1]                                      # last hidden == last output row
    return dec_out, (h_n[None, ...], c_n[None, ...])


def decoder_forward_ref(params, decoder_input, hidden):
    """Pure-JAX reference (lax.scan) for correctness checking."""
    h0, c0 = hidden
    emb = params.embedding[decoder_input].astype(jnp.float32)   # (B, T, E)
    H = params.H
    w_ih_t, w_hh_t = params.w_ih.T, params.w_hh.T
    bias = params.b_ih + params.b_hh

    def step(carry, x_t):
        h, c = carry
        gates = x_t @ w_ih_t + h @ w_hh_t + bias
        i = jax.nn.sigmoid(gates[:, 0 * H:1 * H])
        f = jax.nn.sigmoid(gates[:, 1 * H:2 * H])
        g = jnp.tanh(gates[:, 2 * H:3 * H])
        o = jax.nn.sigmoid(gates[:, 3 * H:4 * H])
        c_new = f * c + i * g
        h_new = o * jnp.tanh(c_new)
        return (h_new, c_new), h_new

    (h_n, c_n), outs = jax.lax.scan(step, (h0[0], c0[0]),
                                    jnp.transpose(emb, (1, 0, 2)))
    return jnp.transpose(outs, (1, 0, 2)), (h_n[None], c_n[None])


if __name__ == "__main__":
    # Small shapes: batch=2, seq=8, embedding=16, hidden=32, vocab=40
    B, T, E, H, V = 2, 8, 16, 32, 40

    key = jax.random.PRNGKey(0)
    k_params, k_tok, k_h, k_c = jax.random.split(key, 4)

    params = DecoderParams(k_params, E, H, V)
    decoder_input = jax.random.randint(k_tok, (B, T), 0, V, dtype=jnp.int32)
    h0 = jax.random.normal(k_h, (1, B, H), jnp.float32)
    c0 = jax.random.normal(k_c, (1, B, H), jnp.float32)

    dec_out, (h_n, c_n) = decoder_forward(params, decoder_input, (h0, c0))
    jax.block_until_ready((dec_out, h_n, c_n))

    # Correctness check against pure-JAX reference
    ref_out, (ref_h, ref_c) = decoder_forward_ref(params, decoder_input, (h0, c0))
    assert dec_out.shape == (B, T, H)
    assert h_n.shape == (1, B, H) and c_n.shape == (1, B, H)
    assert jnp.allclose(dec_out, ref_out, atol=1e-5, rtol=1e-5)
    assert jnp.allclose(h_n, ref_h, atol=1e-5, rtol=1e-5)
    assert jnp.allclose(c_n, ref_c, atol=1e-5, rtol=1e-5)

    print("KERNEL_OK")
</pallas_src>

<mosaic_0001>
module attributes {stable_mosaic.version = 11 : i64} {
  func.func @decoder_lstm_kernel(%arg0: i32, %arg1: memref<16x16xf32, #tpu.memory_space<vmem>>, %arg2: memref<2x32xf32, #tpu.memory_space<vmem>>, %arg3: memref<2x32xf32, #tpu.memory_space<vmem>>, %arg4: memref<16x128xf32, #tpu.memory_space<vmem>>, %arg5: memref<32x128xf32, #tpu.memory_space<vmem>>, %arg6: memref<1x128xf32, #tpu.memory_space<vmem>>, %arg7: memref<8x2x32xf32, #tpu.memory_space<vmem>>, %arg8: memref<2x32xf32, #tpu.memory_space<vmem>>, %arg9: memref<16x128xf32, #tpu.memory_space<vmem>>) attributes {dimension_semantics = [#tpu.dimension_semantics<arbitrary>], iteration_bounds = array<i64: 1>, scalar_prefetch = 0 : i64, scratch_operands = 1 : i64, tpu.core_type = #tpu.core_type<tc>, window_params = [{pipeline_mode = #tpu.pipeline_mode<synchronous>, transform_indices = @transform_0, window_bounds = array<i64: 16, 16>}, {pipeline_mode = #tpu.pipeline_mode<synchronous>, transform_indices = @transform_1, window_bounds = array<i64: 2, 32>}, {pipeline_mode = #tpu.pipeline_mode<synchronous>, transform_indices = @transform_2, window_bounds = array<i64: 2, 32>}, {pipeline_mode = #tpu.pipeline_mode<synchronous>, transform_indices = @transform_3, window_bounds = array<i64: 16, 128>}, {pipeline_mode = #tpu.pipeline_mode<synchronous>, transform_indices = @transform_4, window_bounds = array<i64: 32, 128>}, {pipeline_mode = #tpu.pipeline_mode<synchronous>, transform_indices = @transform_5, window_bounds = array<i64: 1, 128>}, {pipeline_mode = #tpu.pipeline_mode<synchronous>, transform_indices = @transform_6, window_bounds = array<i64: 8, 2, 32>}, {pipeline_mode = #tpu.pipeline_mode<synchronous>, transform_indices = @transform_7, window_bounds = array<i64: 2, 32>}]} {
    %c0 = arith.constant 0 : index
    %c0_0 = arith.constant 0 : index
    %0 = vector.load %arg1[%c0, %c0_0] : memref<16x16xf32, #tpu.memory_space<vmem>>, vector<16x16xf32>
    %c0_1 = arith.constant 0 : index
    %c0_2 = arith.constant 0 : index
    %1 = vector.load %arg4[%c0_1, %c0_2] : memref<16x128xf32, #tpu.memory_space<vmem>>, vector<16x128xf32>
    %cst = arith.constant dense<0.000000e+00> : vector<16x128xf32>
    %2 = tpu.matmul %0, %1, %cst {dimension_numbers = #tpu.dot_dimension_numbers<[1], [0], [0], [1], [0, 0, 1, 1], [], []>} : vector<16x16xf32>, vector<16x128xf32>, vector<16x128xf32> -> vector<16x128xf32>
    %c0_3 = arith.constant 0 : index
    %c0_4 = arith.constant 0 : index
    %3 = vector.load %arg6[%c0_3, %c0_4] : memref<1x128xf32, #tpu.memory_space<vmem>>, vector<1x128xf32>
    %4 = vector.broadcast %3 : vector<1x128xf32> to vector<16x128xf32>
    %5 = arith.addf %2, %4 : vector<16x128xf32>
    %c0_5 = arith.constant 0 : index
    %c0_6 = arith.constant 0 : index
    %6 = vector.load %arg9[%c0_5, %c0_6] : memref<16x128xf32, #tpu.memory_space<vmem>>, vector<16x128xf32>
    tpu.vector_store %arg9[%c0_5, %c0_6], %5 {strides = array<i32>} : memref<16x128xf32, #tpu.memory_space<vmem>>, vector<16x128xf32>,
    %c0_7 = arith.constant 0 : index
    %c0_8 = arith.constant 0 : index
    %7 = vector.load %arg5[%c0_7, %c0_8] : memref<32x128xf32, #tpu.memory_space<vmem>>, vector<32x128xf32>
    %c0_9 = arith.constant 0 : index
    %c0_10 = arith.constant 0 : index
    %8 = vector.load %arg2[%c0_9, %c0_10] : memref<2x32xf32, #tpu.memory_space<vmem>>, vector<2x32xf32>
    %c0_11 = arith.constant 0 : index
    %c0_12 = arith.constant 0 : index
    %9 = vector.load %arg3[%c0_11, %c0_12] : memref<2x32xf32, #tpu.memory_space<vmem>>, vector<2x32xf32>
    %c0_i32 = arith.constant 0 : i32
    %c2_i32 = arith.constant 2 : i32
    %10 = arith.muli %c0_i32, %c2_i32 : i32
    %11 = tpu.assume_multiple %10, 2 : i32
    %12 = arith.index_cast %11 : i32 to index
    %c0_13 = arith.constant 0 : index
    %13 = vector.load %arg9[%12, %c0_13] : memref<16x128xf32, #tpu.memory_space<vmem>>, vector<2x128xf32>
    %cst_14 = arith.constant dense<0.000000e+00> : vector<2x128xf32>
    %14 = tpu.matmul %8, %7, %cst_14 {dimension_numbers = #tpu.dot_dimension_numbers<[1], [0], [0], [1], [0, 0, 1, 1], [], []>} : vector<2x32xf32>, vector<32x128xf32>, vector<2x128xf32> -> vector<2x128xf32>
    %15 = arith.addf %13, %14 : vector<2x128xf32>
    %16 = vector.extract_strided_slice %15 {offsets = [0, 0], sizes = [2, 32], strides = [1, 1]} : vector<2x128xf32> to vector<2x32xf32>
    %17 = arith.negf %16 : vector<2x32xf32>
    %18 = math.exp %17 : vector<2x32xf32>
    %cst_15 = arith.constant 1.000000e+00 : f32
    %19 = vector.broadcast %cst_15 : f32 to vector<2x32xf32>
    %20 = arith.addf %19, %18 : vector<2x32xf32>
    %21 = arith.divf %19, %20 : vector<2x32xf32>
    %22 = vector.extract_strided_slice %15 {offsets = [0, 32], sizes = [2, 32], strides = [1, 1]} : vector<2x128xf32> to vector<2x32xf32>
    %23 = arith.negf %22 : vector<2x32xf32>
    %24 = math.exp %23 : vector<2x32xf32>
    %cst_16 = arith.constant 1.000000e+00 : f32
    %25 = vector.broadcast %cst_16 : f32 to vector<2x32xf32>
    %26 = arith.addf %25, %24 : vector<2x32xf32>
    %27 = arith.divf %25, %26 : vector<2x32xf32>
    %28 = vector.extract_strided_slice %15 {offsets = [0, 64], sizes = [2, 32], strides = [1, 1]} : vector<2x128xf32> to vector<2x32xf32>
    %29 = math.tanh %28 : vector<2x32xf32>
    %30 = vector.extract_strided_slice %15 {offsets = [0, 96], sizes = [2, 32], strides = [1, 1]} : vector<2x128xf32> to vector<2x32xf32>
    %31 = arith.negf %30 : vector<2x32xf32>
    %32 = math.exp %31 : vector<2x32xf32>
    %cst_17 = arith.constant 1.000000e+00 : f32
    %33 = vector.broadcast %cst_17 : f32 to vector<2x32xf32>
    %34 = arith.addf %33, %32 : vector<2x32xf32>
    %35 = arith.divf %33, %34 : vector<2x32xf32>
    %36 = arith.mulf %27, %9 : vector<2x32xf32>
    %37 = arith.mulf %21, %29 : vector<2x32xf32>
    %38 = arith.addf %36, %37 : vector<2x32xf32>
    %39 = math.tanh %38 : vector<2x32xf32>
    %40 = arith.mulf %35, %39 : vector<2x32xf32>
    %41 = arith.index_cast %c0_i32 : i32 to index
    %c0_18 = arith.constant 0 : index
    %c0_19 = arith.constant 0 : index
    %42 = vector.load %arg7[%41, %c0_18, %c0_19] : memref<8x2x32xf32, #tpu.memory_space<vmem>>, vector<1x2x32xf32>
    %43 = vector.shape_cast %42 : vector<1x2x32xf32> to vector<2x32xf32>
    %44 = vector.shape_cast %40 : vector<2x32xf32> to vector<1x2x32xf32>
    tpu.vector_store %arg7[%41, %c0_18, %c0_19], %44 {strides = array<i32>} : memref<8x2x32xf32, #tpu.memory_space<vmem>>, vector<1x2x32xf32>,
    %c1_i32 = arith.constant 1 : i32
    %c2_i32_20 = arith.constant 2 : i32
    %45 = arith.muli %c1_i32, %c2_i32_20 : i32
    %46 = tpu.assume_multiple %45, 2 : i32
    %47 = arith.index_cast %46 : i32 to index
    %c0_21 = arith.constant 0 : index
    %48 = vector.load %arg9[%47, %c0_21] : memref<16x128xf32, #tpu.memory_space<vmem>>, vector<2x128xf32>
    %cst_22 = arith.constant dense<0.000000e+00> : vector<2x128xf32>
    %49 = tpu.matmul %40, %7, %cst_22 {dimension_numbers = #tpu.dot_dimension_numbers<[1], [0], [0], [1], [0, 0, 1, 1], [], []>} : vector<2x32xf32>, vector<32x128xf32>, vector<2x128xf32> -> vector<2x128xf32>
    %50 = arith.addf %48, %49 : vector<2x128xf32>
    %51 = vector.extract_strided_slice %50 {offsets = [0, 0], sizes = [2, 32], strides = [1, 1]} : vector<2x128xf32> to vector<2x32xf32>
    %52 = arith.negf %51 : vector<2x32xf32>
    %53 = math.exp %52 : vector<2x32xf32>
    %cst_23 = arith.constant 1.000000e+00 : f32
    %54 = vector.broadcast %cst_23 : f32 to vector<2x32xf32>
    %55 = arith.addf %54, %53 : vector<2x32xf32>
    %56 = arith.divf %54, %55 : vector<2x32xf32>
    %57 = vector.extract_strided_slice %50 {offsets = [0, 32], sizes = [2, 32], strides = [1, 1]} : vector<2x128xf32> to vector<2x32xf32>
    %58 = arith.negf %57 : vector<2x32xf32>
    %59 = math.exp %58 : vector<2x32xf32>
    %cst_24 = arith.constant 1.000000e+00 : f32
    %60 = vector.broadcast %cst_24 : f32 to vector<2x32xf32>
    %61 = arith.addf %60, %59 : vector<2x32xf32>
    %62 = arith.divf %60, %61 : vector<2x32xf32>
    %63 = vector.extract_strided_slice %50 {offsets = [0, 64], sizes = [2, 32], strides = [1, 1]} : vector<2x128xf32> to vector<2x32xf32>
    %64 = math.tanh %63 : vector<2x32xf32>
    %65 = vector.extract_strided_slice %50 {offsets = [0, 96], sizes = [2, 32], strides = [1, 1]} : vector<2x128xf32> to vector<2x32xf32>
    %66 = arith.negf %65 : vector<2x32xf32>
    %67 = math.exp %66 : vector<2x32xf32>
    %cst_25 = arith.constant 1.000000e+00 : f32
    %68 = vector.broadcast %cst_25 : f32 to vector<2x32xf32>
    %69 = arith.addf %68, %67 : vector<2x32xf32>
    %70 = arith.divf %68, %69 : vector<2x32xf32>
    %71 = arith.mulf %62, %38 : vector<2x32xf32>
    %72 = arith.mulf %56, %64 : vector<2x32xf32>
    %73 = arith.addf %71, %72 : vector<2x32xf32>
    %74 = math.tanh %73 : vector<2x32xf32>
    %75 = arith.mulf %70, %74 : vector<2x32xf32>
    %76 = arith.index_cast %c1_i32 : i32 to index
    %c0_26 = arith.constant 0 : index
    %c0_27 = arith.constant 0 : index
    %77 = vector.load %arg7[%76, %c0_26, %c0_27] : memref<8x2x32xf32, #tpu.memory_space<vmem>>, vector<1x2x32xf32>
    %78 = vector.shape_cast %77 : vector<1x2x32xf32> to vector<2x32xf32>
    %79 = vector.shape_cast %75 : vector<2x32xf32> to vector<1x2x32xf32>
    tpu.vector_store %arg7[%76, %c0_26, %c0_27], %79 {strides = array<i32>} : memref<8x2x32xf32, #tpu.memory_space<vmem>>, vector<1x2x32xf32>,
    %c2_i32_28 = arith.constant 2 : i32
    %c2_i32_29 = arith.constant 2 : i32
    %80 = arith.muli %c2_i32_28, %c2_i32_29 : i32
    %81 = tpu.assume_multiple %80, 2 : i32
    %82 = arith.index_cast %81 : i32 to index
    %c0_30 = arith.constant 0 : index
    %83 = vector.load %arg9[%82, %c0_30] : memref<16x128xf32, #tpu.memory_space<vmem>>, vector<2x128xf32>
    %cst_31 = arith.constant dense<0.000000e+00> : vector<2x128xf32>
    %84 = tpu.matmul %75, %7, %cst_31 {dimension_numbers = #tpu.dot_dimension_numbers<[1], [0], [0], [1], [0, 0, 1, 1], [], []>} : vector<2x32xf32>, vector<32x128xf32>, vector<2x128xf32> -> vector<2x128xf32>
    %85 = arith.addf %83, %84 : vector<2x128xf32>
    %86 = vector.extract_strided_slice %85 {offsets = [0, 0], sizes = [2, 32], strides = [1, 1]} : vector<2x128xf32> to vector<2x32xf32>
    %87 = arith.negf %86 : vector<2x32xf32>
    %88 = math.exp %87 : vector<2x32xf32>
    %cst_32 = arith.constant 1.000000e+00 : f32
    %89 = vector.broadcast %cst_32 : f32 to vector<2x32xf32>
    %90 = arith.addf %89, %88 : vector<2x32xf32>
    %91 = arith.divf %89, %90 : vector<2x32xf32>
    %92 = vector.extract_strided_slice %85 {offsets = [0, 32], sizes = [2, 32], strides = [1, 1]} : vector<2x128xf32> to vector<2x32xf32>
    %93 = arith.negf %92 : vector<2x32xf32>
    %94 = math.exp %93 : vector<2x32xf32>
    %cst_33 = arith.constant 1.000000e+00 : f32
    %95 = vector.broadcast %cst_33 : f32 to vector<2x32xf32>
    %96 = arith.addf %95, %94 : vector<2x32xf32>
    %97 = arith.divf %95, %96 : vector<2x32xf32>
    %98 = vector.extract_strided_slice %85 {offsets = [0, 64], sizes = [2, 32], strides = [1, 1]} : vector<2x128xf32> to vector<2x32xf32>
    %99 = math.tanh %98 : vector<2x32xf32>
    %100 = vector.extract_strided_slice %85 {offsets = [0, 96], sizes = [2, 32], strides = [1, 1]} : vector<2x128xf32> to vector<2x32xf32>
    %101 = arith.negf %100 : vector<2x32xf32>
    %102 = math.exp %101 : vector<2x32xf32>
    %cst_34 = arith.constant 1.000000e+00 : f32
    %103 = vector.broadcast %cst_34 : f32 to vector<2x32xf32>
    %104 = arith.addf %103, %102 : vector<2x32xf32>
    %105 = arith.divf %103, %104 : vector<2x32xf32>
    %106 = arith.mulf %97, %73 : vector<2x32xf32>
    %107 = arith.mulf %91, %99 : vector<2x32xf32>
    %108 = arith.addf %106, %107 : vector<2x32xf32>
    %109 = math.tanh %108 : vector<2x32xf32>
    %110 = arith.mulf %105, %109 : vector<2x32xf32>
    %111 = arith.index_cast %c2_i32_28 : i32 to index
    %c0_35 = arith.constant 0 : index
    %c0_36 = arith.constant 0 : index
    %112 = vector.load %arg7[%111, %c0_35, %c0_36] : memref<8x2x32xf32, #tpu.memory_space<vmem>>, vector<1x2x32xf32>
    %113 = vector.shape_cast %112 : vector<1x2x32xf32> to vector<2x32xf32>
    %114 = vector.shape_cast %110 : vector<2x32xf32> to vector<1x2x32xf32>
    tpu.vector_store %arg7[%111, %c0_35, %c0_36], %114 {strides = array<i32>} : memref<8x2x32xf32, #tpu.memory_space<vmem>>, vector<1x2x32xf32>,
    %c3_i32 = arith.constant 3 : i32
    %c2_i32_37 = arith.constant 2 : i32
    %115 = arith.muli %c3_i32, %c2_i32_37 : i32
    %116 = tpu.assume_multiple %115, 2 : i32
    %117 = arith.index_cast %116 : i32 to index
    %c0_38 = arith.constant 0 : index
    %118 = vector.load %arg9[%117, %c0_38] : memref<16x128xf32, #tpu.memory_space<vmem>>, vector<2x128xf32>
    %cst_39 = arith.constant dense<0.000000e+00> : vector<2x128xf32>
    %119 = tpu.matmul %110, %7, %cst_39 {dimension_numbers = #tpu.dot_dimension_numbers<[1], [0], [0], [1], [0, 0, 1, 1], [], []>} : vector<2x32xf32>, vector<32x128xf32>, vector<2x128xf32> -> vector<2x128xf32>
    %120 = arith.addf %118, %119 : vector<2x128xf32>
    %121 = vector.extract_strided_slice %120 {offsets = [0, 0], sizes = [2, 32], strides = [1, 1]} : vector<2x128xf32> to vector<2x32xf32>
    %122 = arith.negf %121 : vector<2x32xf32>
    %123 = math.exp %122 : vector<2x32xf32>
    %cst_40 = arith.constant 1.000000e+00 : f32
    %124 = vector.broadcast %cst_40 : f32 to vector<2x32xf32>
    %125 = arith.addf %124, %123 : vector<2x32xf32>
    %126 = arith.divf %124, %125 : vector<2x32xf32>
    %127 = vector.extract_strided_slice %120 {offsets = [0, 32], sizes = [2, 32], strides = [1, 1]} : vector<2x128xf32> to vector<2x32xf32>
    %128 = arith.negf %127 : vector<2x32xf32>
    %129 = math.exp %128 : vector<2x32xf32>
    %cst_41 = arith.constant 1.000000e+00 : f32
    %130 = vector.broadcast %cst_41 : f32 to vector<2x32xf32>
    %131 = arith.addf %130, %129 : vector<2x32xf32>
    %132 = arith.divf %130, %131 : vector<2x32xf32>
    %133 = vector.extract_strided_slice %120 {offsets = [0, 64], sizes = [2, 32], strides = [1, 1]} : vector<2x128xf32> to vector<2x32xf32>
    %134 = math.tanh %133 : vector<2x32xf32>
    %135 = vector.extract_strided_slice %120 {offsets = [0, 96], sizes = [2, 32], strides = [1, 1]} : vector<2x128xf32> to vector<2x32xf32>
    %136 = arith.negf %135 : vector<2x32xf32>
    %137 = math.exp %136 : vector<2x32xf32>
    %cst_42 = arith.constant 1.000000e+00 : f32
    %138 = vector.broadcast %cst_42 : f32 to vector<2x32xf32>
    %139 = arith.addf %138, %137 : vector<2x32xf32>
    %140 = arith.divf %138, %139 : vector<2x32xf32>
    %141 = arith.mulf %132, %108 : vector<2x32xf32>
    %142 = arith.mulf %126, %134 : vector<2x32xf32>
    %143 = arith.addf %141, %142 : vector<2x32xf32>
    %144 = math.tanh %143 : vector<2x32xf32>
    %145 = arith.mulf %140, %144 : vector<2x32xf32>
    %146 = arith.index_cast %c3_i32 : i32 to index
    %c0_43 = arith.constant 0 : index
    %c0_44 = arith.constant 0 : index
    %147 = vector.load %arg7[%146, %c0_43, %c0_44] : memref<8x2x32xf32, #tpu.memory_space<vmem>>, vector<1x2x32xf32>
    %148 = vector.shape_cast %147 : vector<1x2x32xf32> to vector<2x32xf32>
    %149 = vector.shape_cast %145 : vector<2x32xf32> to vector<1x2x32xf32>
    tpu.vector_store %arg7[%146, %c0_43, %c0_44], %149 {strides = array<i32>} : memref<8x2x32xf32, #tpu.memory_space<vmem>>, vector<1x2x32xf32>,
    %c4_i32 = arith.constant 4 : i32
    %c2_i32_45 = arith.constant 2 : i32
    %150 = arith.muli %c4_i32, %c2_i32_45 : i32
    %151 = tpu.assume_multiple %150, 2 : i32
    %152 = arith.index_cast %151 : i32 to index
    %c0_46 = arith.constant 0 : index
    %153 = vector.load %arg9[%152, %c0_46] : memref<16x128xf32, #tpu.memory_space<vmem>>, vector<2x128xf32>
    %cst_47 = arith.constant dense<0.000000e+00> : vector<2x128xf32>
    %154 = tpu.matmul %145, %7, %cst_47 {dimension_numbers = #tpu.dot_dimension_numbers<[1], [0], [0], [1], [0, 0, 1, 1], [], []>} : vector<2x32xf32>, vector<32x128xf32>, vector<2x128xf32> -> vector<2x128xf32>
    %155 = arith.addf %153, %154 : vector<2x128xf32>
    %156 = vector.extract_strided_slice %155 {offsets = [0, 0], sizes = [2, 32], strides = [1, 1]} : vector<2x128xf32> to vector<2x32xf32>
    %157 = arith.negf %156 : vector<2x32xf32>
    %158 = math.exp %157 : vector<2x32xf32>
    %cst_48 = arith.constant 1.000000e+00 : f32
    %159 = vector.broadcast %cst_48 : f32 to vector<2x32xf32>
    %160 = arith.addf %159, %158 : vector<2x32xf32>
    %161 = arith.divf %159, %160 : vector<2x32xf32>
    %162 = vector.extract_strided_slice %155 {offsets = [0, 32], sizes = [2, 32], strides = [1, 1]} : vector<2x128xf32> to vector<2x32xf32>
    %163 = arith.negf %162 : vector<2x32xf32>
    %164 = math.exp %163 : vector<2x32xf32>
    %cst_49 = arith.constant 1.000000e+00 : f32
    %165 = vector.broadcast %cst_49 : f32 to vector<2x32xf32>
    %166 = arith.addf %165, %164 : vector<2x32xf32>
    %167 = arith.divf %165, %166 : vector<2x32xf32>
    %168 = vector.extract_strided_slice %155 {offsets = [0, 64], sizes = [2, 32], strides = [1, 1]} : vector<2x128xf32> to vector<2x32xf32>
    %169 = math.tanh %168 : vector<2x32xf32>
    %170 = vector.extract_strided_slice %155 {offsets = [0, 96], sizes = [2, 32], strides = [1, 1]} : vector<2x128xf32> to vector<2x32xf32>
    %171 = arith.negf %170 : vector<2x32xf32>
    %172 = math.exp %171 : vector<2x32xf32>
    %cst_50 = arith.constant 1.000000e+00 : f32
    %173 = vector.broadcast %cst_50 : f32 to vector<2x32xf32>
    %174 = arith.addf %173, %172 : vector<2x32xf32>
    %175 = arith.divf %173, %174 : vector<2x32xf32>
    %176 = arith.mulf %167, %143 : vector<2x32xf32>
    %177 = arith.mulf %161, %169 : vector<2x32xf32>
    %178 = arith.addf %176, %177 : vector<2x32xf32>
    %179 = math.tanh %178 : vector<2x32xf32>
    %180 = arith.mulf %175, %179 : vector<2x32xf32>
    %181 = arith.index_cast %c4_i32 : i32 to index
    %c0_51 = arith.constant 0 : index
    %c0_52 = arith.constant 0 : index
    %182 = vector.load %arg7[%181, %c0_51, %c0_52] : memref<8x2x32xf32, #tpu.memory_space<vmem>>, vector<1x2x32xf32>
    %183 = vector.shape_cast %182 : vector<1x2x32xf32> to vector<2x32xf32>
    %184 = vector.shape_cast %180 : vector<2x32xf32> to vector<1x2x32xf32>
    tpu.vector_store %arg7[%181, %c0_51, %c0_52], %184 {strides = array<i32>} : memref<8x2x32xf32, #tpu.memory_space<vmem>>, vector<1x2x32xf32>,
    %c5_i32 = arith.constant 5 : i32
    %c2_i32_53 = arith.constant 2 : i32
    %185 = arith.muli %c5_i32, %c2_i32_53 : i32
    %186 = tpu.assume_multiple %185, 2 : i32
    %187 = arith.index_cast %186 : i32 to index
    %c0_54 = arith.constant 0 : index
    %188 = vector.load %arg9[%187, %c0_54] : memref<16x128xf32, #tpu.memory_space<vmem>>, vector<2x128xf32>
    %cst_55 = arith.constant dense<0.000000e+00> : vector<2x128xf32>
    %189 = tpu.matmul %180, %7, %cst_55 {dimension_numbers = #tpu.dot_dimension_numbers<[1], [0], [0], [1], [0, 0, 1, 1], [], []>} : vector<2x32xf32>, vector<32x128xf32>, vector<2x128xf32> -> vector<2x128xf32>
    %190 = arith.addf %188, %189 : vector<2x128xf32>
    %191 = vector.extract_strided_slice %190 {offsets = [0, 0], sizes = [2, 32], strides = [1, 1]} : vector<2x128xf32> to vector<2x32xf32>
    %192 = arith.negf %191 : vector<2x32xf32>
    %193 = math.exp %192 : vector<2x32xf32>
    %cst_56 = arith.constant 1.000000e+00 : f32
    %194 = vector.broadcast %cst_56 : f32 to vector<2x32xf32>
    %195 = arith.addf %194, %193 : vector<2x32xf32>
    %196 = arith.divf %194, %195 : vector<2x32xf32>
    %197 = vector.extract_strided_slice %190 {offsets = [0, 32], sizes = [2, 32], strides = [1, 1]} : vector<2x128xf32> to vector<2x32xf32>
    %198 = arith.negf %197 : vector<2x32xf32>
    %199 = math.exp %198 : vector<2x32xf32>
    %cst_57 = arith.constant 1.000000e+00 : f32
    %200 = vector.broadcast %cst_57 : f32 to vector<2x32xf32>
    %201 = arith.addf %200, %199 : vector<2x32xf32>
    %202 = arith.divf %200, %201 : vector<2x32xf32>
    %203 = vector.extract_strided_slice %190 {offsets = [0, 64], sizes = [2, 32], strides = [1, 1]} : vector<2x128xf32> to vector<2x32xf32>
    %204 = math.tanh %203 : vector<2x32xf32>
    %205 = vector.extract_strided_slice %190 {offsets = [0, 96], sizes = [2, 32], strides = [1, 1]} : vector<2x128xf32> to vector<2x32xf32>
    %206 = arith.negf %205 : vector<2x32xf32>
    %207 = math.exp %206 : vector<2x32xf32>
    %cst_58 = arith.constant 1.000000e+00 : f32
    %208 = vector.broadcast %cst_58 : f32 to vector<2x32xf32>
    %209 = arith.addf %208, %207 : vector<2x32xf32>
    %210 = arith.divf %208, %209 : vector<2x32xf32>
    %211 = arith.mulf %202, %178 : vector<2x32xf32>
    %212 = arith.mulf %196, %204 : vector<2x32xf32>
    %213 = arith.addf %211, %212 : vector<2x32xf32>
    %214 = math.tanh %213 : vector<2x32xf32>
    %215 = arith.mulf %210, %214 : vector<2x32xf32>
    %216 = arith.index_cast %c5_i32 : i32 to index
    %c0_59 = arith.constant 0 : index
    %c0_60 = arith.constant 0 : index
    %217 = vector.load %arg7[%216, %c0_59, %c0_60] : memref<8x2x32xf32, #tpu.memory_space<vmem>>, vector<1x2x32xf32>
    %218 = vector.shape_cast %217 : vector<1x2x32xf32> to vector<2x32xf32>
    %219 = vector.shape_cast %215 : vector<2x32xf32> to vector<1x2x32xf32>
    tpu.vector_store %arg7[%216, %c0_59, %c0_60], %219 {strides = array<i32>} : memref<8x2x32xf32, #tpu.memory_space<vmem>>, vector<1x2x32xf32>,
    %c6_i32 = arith.constant 6 : i32
    %c2_i32_61 = arith.constant 2 : i32
    %220 = arith.muli %c6_i32, %c2_i32_61 : i32
    %221 = tpu.assume_multiple %220, 2 : i32
    %222 = arith.index_cast %221 : i32 to index
    %c0_62 = arith.constant 0 : index
    %223 = vector.load %arg9[%222, %c0_62] : memref<16x128xf32, #tpu.memory_space<vmem>>, vector<2x128xf32>
    %cst_63 = arith.constant dense<0.000000e+00> : vector<2x128xf32>
    %224 = tpu.matmul %215, %7, %cst_63 {dimension_numbers = #tpu.dot_dimension_numbers<[1], [0], [0], [1], [0, 0, 1, 1], [], []>} : vector<2x32xf32>, vector<32x128xf32>, vector<2x128xf32> -> vector<2x128xf32>
    %225 = arith.addf %223, %224 : vector<2x128xf32>
    %226 = vector.extract_strided_slice %225 {offsets = [0, 0], sizes = [2, 32], strides = [1, 1]} : vector<2x128xf32> to vector<2x32xf32>
    %227 = arith.negf %226 : vector<2x32xf32>
    %228 = math.exp %227 : vector<2x32xf32>
    %cst_64 = arith.constant 1.000000e+00 : f32
    %229 = vector.broadcast %cst_64 : f32 to vector<2x32xf32>
    %230 = arith.addf %229, %228 : vector<2x32xf32>
    %231 = arith.divf %229, %230 : vector<2x32xf32>
    %232 = vector.extract_strided_slice %225 {offsets = [0, 32], sizes = [2, 32], strides = [1, 1]} : vector<2x128xf32> to vector<2x32xf32>
    %233 = arith.negf %232 : vector<2x32xf32>
    %234 = math.exp %233 : vector<2x32xf32>
    %cst_65 = arith.constant 1.000000e+00 : f32
    %235 = vector.broadcast %cst_65 : f32 to vector<2x32xf32>
    %236 = arith.addf %235, %234 : vector<2x32xf32>
    %237 = arith.divf %235, %236 : vector<2x32xf32>
    %238 = vector.extract_strided_slice %225 {offsets = [0, 64], sizes = [2, 32], strides = [1, 1]} : vector<2x128xf32> to vector<2x32xf32>
    %239 = math.tanh %238 : vector<2x32xf32>
    %240 = vector.extract_strided_slice %225 {offsets = [0, 96], sizes = [2, 32], strides = [1, 1]} : vector<2x128xf32> to vector<2x32xf32>
    %241 = arith.negf %240 : vector<2x32xf32>
    %242 = math.exp %241 : vector<2x32xf32>
    %cst_66 = arith.constant 1.000000e+00 : f32
    %243 = vector.broadcast %cst_66 : f32 to vector<2x32xf32>
    %244 = arith.addf %243, %242 : vector<2x32xf32>
    %245 = arith.divf %243, %244 : vector<2x32xf32>
    %246 = arith.mulf %237, %213 : vector<2x32xf32>
    %247 = arith.mulf %231, %239 : vector<2x32xf32>
    %248 = arith.addf %246, %247 : vector<2x32xf32>
    %249 = math.tanh %248 : vector<2x32xf32>
    %250 = arith.mulf %245, %249 : vector<2x32xf32>
    %251 = arith.index_cast %c6_i32 : i32 to index
    %c0_67 = arith.constant 0 : index
    %c0_68 = arith.constant 0 : index
    %252 = vector.load %arg7[%251, %c0_67, %c0_68] : memref<8x2x32xf32, #tpu.memory_space<vmem>>, vector<1x2x32xf32>
    %253 = vector.shape_cast %252 : vector<1x2x32xf32> to vector<2x32xf32>
    %254 = vector.shape_cast %250 : vector<2x32xf32> to vector<1x2x32xf32>
    tpu.vector_store %arg7[%251, %c0_67, %c0_68], %254 {strides = array<i32>} : memref<8x2x32xf32, #tpu.memory_space<vmem>>, vector<1x2x32xf32>,
    %c7_i32 = arith.constant 7 : i32
    %c2_i32_69 = arith.constant 2 : i32
    %255 = arith.muli %c7_i32, %c2_i32_69 : i32
    %256 = tpu.assume_multiple %255, 2 : i32
    %257 = arith.index_cast %256 : i32 to index
    %c0_70 = arith.constant 0 : index
    %258 = vector.load %arg9[%257, %c0_70] : memref<16x128xf32, #tpu.memory_space<vmem>>, vector<2x128xf32>
    %cst_71 = arith.constant dense<0.000000e+00> : vector<2x128xf32>
    %259 = tpu.matmul %250, %7, %cst_71 {dimension_numbers = #tpu.dot_dimension_numbers<[1], [0], [0], [1], [0, 0, 1, 1], [], []>} : vector<2x32xf32>, vector<32x128xf32>, vector<2x128xf32> -> vector<2x128xf32>
    %260 = arith.addf %258, %259 : vector<2x128xf32>
    %261 = vector.extract_strided_slice %260 {offsets = [0, 0], sizes = [2, 32], strides = [1, 1]} : vector<2x128xf32> to vector<2x32xf32>
    %262 = arith.negf %261 : vector<2x32xf32>
    %263 = math.exp %262 : vector<2x32xf32>
    %cst_72 = arith.constant 1.000000e+00 : f32
    %264 = vector.broadcast %cst_72 : f32 to vector<2x32xf32>
    %265 = arith.addf %264, %263 : vector<2x32xf32>
    %266 = arith.divf %264, %265 : vector<2x32xf32>
    %267 = vector.extract_strided_slice %260 {offsets = [0, 32], sizes = [2, 32], strides = [1, 1]} : vector<2x128xf32> to vector<2x32xf32>
    %268 = arith.negf %267 : vector<2x32xf32>
    %269 = math.exp %268 : vector<2x32xf32>
    %cst_73 = arith.constant 1.000000e+00 : f32
    %270 = vector.broadcast %cst_73 : f32 to vector<2x32xf32>
    %271 = arith.addf %270, %269 : vector<2x32xf32>
    %272 = arith.divf %270, %271 : vector<2x32xf32>
    %273 = vector.extract_strided_slice %260 {offsets = [0, 64], sizes = [2, 32], strides = [1, 1]} : vector<2x128xf32> to vector<2x32xf32>
    %274 = math.tanh %273 : vector<2x32xf32>
    %275 = vector.extract_strided_slice %260 {offsets = [0, 96], sizes = [2, 32], strides = [1, 1]} : vector<2x128xf32> to vector<2x32xf32>
    %276 = arith.negf %275 : vector<2x32xf32>
    %277 = math.exp %276 : vector<2x32xf32>
    %cst_74 = arith.constant 1.000000e+00 : f32
    %278 = vector.broadcast %cst_74 : f32 to vector<2x32xf32>
    %279 = arith.addf %278, %277 : vector<2x32xf32>
    %280 = arith.divf %278, %279 : vector<2x32xf32>
    %281 = arith.mulf %272, %248 : vector<2x32xf32>
    %282 = arith.mulf %266, %274 : vector<2x32xf32>
    %283 = arith.addf %281, %282 : vector<2x32xf32>
    %284 = math.tanh %283 : vector<2x32xf32>
    %285 = arith.mulf %280, %284 : vector<2x32xf32>
    %286 = arith.index_cast %c7_i32 : i32 to index
    %c0_75 = arith.constant 0 : index
    %c0_76 = arith.constant 0 : index
    %287 = vector.load %arg7[%286, %c0_75, %c0_76] : memref<8x2x32xf32, #tpu.memory_space<vmem>>, vector<1x2x32xf32>
    %288 = vector.shape_cast %287 : vector<1x2x32xf32> to vector<2x32xf32>
    %289 = vector.shape_cast %285 : vector<2x32xf32> to vector<1x2x32xf32>
    tpu.vector_store %arg7[%286, %c0_75, %c0_76], %289 {strides = array<i32>} : memref<8x2x32xf32, #tpu.memory_space<vmem>>, vector<1x2x32xf32>,
    %c8_i32 = arith.constant 8 : i32
    %c0_77 = arith.constant 0 : index
    %c0_78 = arith.constant 0 : index
    %290 = vector.load %arg8[%c0_77, %c0_78] : memref<2x32xf32, #tpu.memory_space<vmem>>, vector<2x32xf32>
    tpu.vector_store %arg8[%c0_77, %c0_78], %283 {strides = array<i32>} : memref<2x32xf32, #tpu.memory_space<vmem>>, vector<2x32xf32>,
    return
  }
  func.func @transform_0(%arg0: i32) -> (i32, i32) {
    %c0_i32 = arith.constant 0 : i32
    %c0_i32_0 = arith.constant 0 : i32
    %c0_i32_1 = arith.constant 0 : i32
    return %c0_i32, %c0_i32_0 : i32, i32
  }
  func.func @transform_1(%arg0: i32) -> (i32, i32) {
    %c0_i32 = arith.constant 0 : i32
    %c0_i32_0 = arith.constant 0 : i32
    %c0_i32_1 = arith.constant 0 : i32
    return %c0_i32, %c0_i32_0 : i32, i32
  }
  func.func @transform_2(%arg0: i32) -> (i32, i32) {
    %c0_i32 = arith.constant 0 : i32
    %c0_i32_0 = arith.constant 0 : i32
    %c0_i32_1 = arith.constant 0 : i32
    return %c0_i32, %c0_i32_0 : i32, i32
  }
  func.func @transform_3(%arg0: i32) -> (i32, i32) {
    %c0_i32 = arith.constant 0 : i32
    %c0_i32_0 = arith.constant 0 : i32
    %c0_i32_1 = arith.constant 0 : i32
    return %c0_i32, %c0_i32_0 : i32, i32
  }
  func.func @transform_4(%arg0: i32) -> (i32, i32) {
    %c0_i32 = arith.constant 0 : i32
    %c0_i32_0 = arith.constant 0 : i32
    %c0_i32_1 = arith.constant 0 : i32
    return %c0_i32, %c0_i32_0 : i32, i32
  }
  func.func @transform_5(%arg0: i32) -> (i32, i32) {
    %c0_i32 = arith.constant 0 : i32
    %c0_i32_0 = arith.constant 0 : i32
    %c0_i32_1 = arith.constant 0 : i32
    return %c0_i32, %c0_i32_0 : i32, i32
  }
  func.func @transform_6(%arg0: i32) -> (i32, i32, i32) {
    %c0_i32 = arith.constant 0 : i32
    %c0_i32_0 = arith.constant 0 : i32
    %c0_i32_1 = arith.constant 0 : i32
    %c0_i32_2 = arith.constant 0 : i32
    return %c0_i32, %c0_i32_0, %c0_i32_1 : i32, i32, i32
  }
  func.func @transform_7(%arg0: i32) -> (i32, i32) {
    %c0_i32 = arith.constant 0 : i32
    %c0_i32_0 = arith.constant 0 : i32
    %c0_i32_1 = arith.constant 0 : i32
    return %c0_i32, %c0_i32_0 : i32, i32
  }
}

</mosaic_0001>

<bundles_post_ra>
// kernel: tpu_custom_call.1
= control target key start
LH: loop header
LB: loop body
LE: loop exit
PB: predicated region body
PF: predicated region fallthrough
CT: control target
= control target key end

     0   :  { %13 = vsyncpa [#allocation4], 0  ;;  %s1147_s0 = inlined_call_operand.hbm [shape: f32[16,16], index: 0, kind: input, shape index: {}]   ;;  %s1148_s1 = inlined_call_operand.hbm [shape: f32[2,32], index: 1, kind: input, shape index: {}]   ;;  %s1149_s2 = inlined_call_operand.hbm [shape: f32[2,32], index: 2, kind: input, shape index: {}]   ;;  %s1150_s3 = inlined_call_operand.hbm [shape: f32[16,128], index: 3, kind: input, shape index: {}]   ;;  %s1151_s4 = inlined_call_operand.hbm [shape: f32[32,128], index: 4, kind: input, shape index: {}]   ;;  %s1152_s5 = inlined_call_operand.vmem [shape: f32[1,128], index: 5, kind: input, shape index: {}]   ;;  %s1153_s6 = inlined_call_operand.hbm [shape: f32[8,2,32], index: 6, kind: output, shape index: {0}]   ;;  %s1154_s7 = inlined_call_operand.hbm [shape: f32[2,32], index: 7, kind: output, shape index: {1}]  }
   0x1   :  { %14 = vsyncpa [#allocation7], 0 }
   0x2   :  { %15 = vsyncpa [#allocation10], 0 }
   0x3   :  { %16 = vsyncpa [#allocation5], 0  ;;  %s36_s26 = sshll.u32 %s1148_s1, 4  ;;  %s37_s26 = int_to_ptr.hbm [resolvable:$true] %s36_s26 }
   0x4   :  { %17 = vsyncpa [#allocation14], 0  ;;  %s1012_s27 = smov [#allocation6]   ;;  %s57_s8 = sshll.u32 %s1150_s3, 4  ;;  %s58_s8 = int_to_ptr.hbm [resolvable:$true] %s57_s8 }
   0x5   :  { %s38_s28 = sshll.u32 %s1012_s27, 4  ;;  %s1013_s9 = smov [#allocation9]   ;;  %s39_s28 = int_to_ptr.vmem [resolvable:$true] %s38_s28 }
   0x6   :  { %41 = dma.hbm_to_vmem [thread:$0]  %s37_s26, 32, %s39_s28, [#allocation7]  }
   0x7   :  { %s59_s10 = sshll.u32 %s1013_s9, 4  ;;  %s22_s13 = sshll.u32 %s1147_s0, 4  ;;  %s60_s10 = int_to_ptr.vmem [resolvable:$true] %s59_s10  ;;  %s23_s13 = int_to_ptr.hbm [resolvable:$true] %s22_s13 }
   0x8   :  { %s1014_s1 = smov 128   ;;  %s1015_s14 = smov 8  }
   0x9   :  { %65 = dma.hbm_to_vmem [thread:$0]  %s58_s8, 256, %s60_s10, [#allocation10], %s1014_s1, %s1014_s1, %s1015_s14  }
   0xa   :  { %s47_s17 = sshll.u32 %s1149_s2, 4  ;;  %s1016_s18 = smov [#allocation3]   ;;  %s48_s17 = int_to_ptr.hbm [resolvable:$true] %s47_s17 }
   0xb   :  { %s24_s19 = sshll.u32 %s1016_s18, 4  ;;  %s1017_s3 = smov [#allocation8]   ;;  %s25_s19 = int_to_ptr.vmem [resolvable:$true] %s24_s19 }
   0xc   :  { %30 = dma.hbm_to_vmem [thread:$0]  %s23_s13, 256, %s25_s19, [#allocation4], %s1014_s1, %s1014_s1, %s1015_s14  }
   0xd   :  { %s49_s20 = sshll.u32 %s1017_s3, 4  ;;  %s70_s0 = sshll.u32 %s1151_s4, 4  ;;  %s50_s20 = int_to_ptr.vmem [resolvable:$true] %s49_s20  ;;  %s71_s0 = int_to_ptr.hbm [resolvable:$true] %s70_s0 }
   0xe   :  { %52 = dma.hbm_to_vmem [thread:$0]  %s48_s17, 32, %s50_s20, [#allocation7]  }
   0xf   :  { %s1018_s23 = smov [#allocation11]  }
  0x10   :  { %s72_s24 = sshll.u32 %s1018_s23, 4  ;;  %s73_s24 = int_to_ptr.vmem [resolvable:$true] %s72_s24 }
  0x11   :  { %78 = dma.hbm_to_vmem [thread:$0]  %s71_s0, 512, %s73_s24, [#allocation10], %s1014_s1, %s1014_s1, %s1015_s14  }
  0x12   :  { %1002 = dma.done.wait [#allocation4], 256  }
  0x13   :  { %1003 = vsyncadd [#allocation4], 4294967040 }
  0x14   :  { %1004 = dma.done.wait [#allocation7], 64  }
  0x15   :  { %1005 = vsyncadd [#allocation7], 4294967232 }
  0x16   :  { %1006 = dma.done.wait [#allocation10], 768  }
  0x17   :  { %1007 = vsyncadd [#allocation10], 4294966528  ;;  %v104_v0 = vld [vmem:[#allocation9 + $0x8] sm:$0xff]  ;;  %v103_v1 = vld [vmem:[#allocation9] sm:$0xff]  ;;  %vm109_vm0 = vcmask 130048   ;;  %vm148_vm1 = vcmask 261120  }
  0x18   :  { %130 = vmatpush.msra.mxu0 %v104_v0  ;;  %v101_v2 = vld [vmem:[#allocation3] sm:$0xff]  ;;  %v143_v4 = vld [vmem:[#allocation11 + $0x10] sm:$0xff]  ;;  %v142_v5 = vld [vmem:[#allocation11 + $0x8] sm:$0xff]  ;;  %s1019_s25 = smov 64   ;;  %s1020_s26 = smov 32   ;;  %vm218_vm6 = vcmask 254976  }
  0x19   :  { %v144_v3 = vld [vmem:[#allocation11 + $0x18] sm:$0xff]  ;;  %v141_v6 = vld [vmem:[#allocation11] sm:$0xff]  ;;  %v145_v7 = vld [vmem:[#allocation6] sm:$0x3]  ;;  %s1022_s27 = smov [#allocation13]   ;;  %s721_s8 = sshll.u32 %s1154_s7, 4  ;;  %s722_s8 = int_to_ptr.hbm [resolvable:$true] %s721_s8 }
  0x1a   :  { %164 = vmatpush.msra.mxu1 %v144_v3  ;;  %236 = vmatpush.msra.mxu2 %v144_v3  ;;  %v1085_v8 = vld [vmem:[%s1152_s5] ss:$0 sm:$0xff]  ;;  %v146_v15 = vld [vmem:[#allocation8] sm:$0x3]  ;;  %s1021_s5 = smov 96   ;;  %s719_s28 = sshll.u32 %s1022_s27, 4  ;;  %s720_s28 = int_to_ptr.vmem [resolvable:$true] %s719_s28 }
  0x1b   :  { %131 = vmatpush.msra.mxu0 %v103_v1  ;;  %304 = vmatpush.msra.mxu3 %v144_v3  ;;  %s1023_s9 = smov [#allocation12]   ;;  %s707_s13 = sshll.u32 %s1153_s6, 4  ;;  %s708_s13 = int_to_ptr.hbm [resolvable:$true] %s707_s13 }
  0x1c   :  { %738 = vmatmul.msk.f32.vlgmr.msra.gmra.mxu0 %vm109_vm0, %v101_v2  ;;  %165 = vmatpush.msra.mxu1 %v143_v4  ;;  %s705_s10 = sshll.u32 %s1023_s9, 4  ;;  %s1024_s7 = smov 2   ;;  %s706_s10 = int_to_ptr.vmem [resolvable:$true] %s705_s10 }
  0x1d   :  { %237 = vmatpush.msra.mxu2 %v143_v4  ;;  %305 = vmatpush.msra.mxu3 %v143_v4 }
  0x1e   :  { %166 = vmatpush.msra.mxu1 %v142_v5  ;;  %576 = vmatpush.msrb.mxu0 %v144_v3 }
  0x1f   :  { %238 = vmatpush.msra.mxu2 %v142_v5  ;;  %306 = vmatpush.msra.mxu3 %v142_v5 }
  0x20   :  { %167 = vmatpush.msra.mxu1 %v141_v6  ;;  %577 = vmatpush.msrb.mxu0 %v143_v4 }
  0x21   :  { %740 = vmatmul.msk.f32.vlgmr.msra.gmra.mxu1 %vm148_vm1, %v145_v7  ;;  %239 = vmatpush.msra.mxu2 %v141_v6 }
  0x22   :  { %307 = vmatpush.msra.mxu3 %v141_v6  ;;  %372 = vmatpush.msrb.mxu1 %v144_v3 }
  0x23   :  { %440 = vmatpush.msrb.mxu2 %v144_v3  ;;  %578 = vmatpush.msrb.mxu0 %v142_v5 }
  0x24   :  { %508 = vmatpush.msrb.mxu3 %v144_v3  ;;  %373 = vmatpush.msrb.mxu1 %v143_v4 }
  0x25   :  { %441 = vmatpush.msrb.mxu2 %v143_v4  ;;  %579 = vmatpush.msrb.mxu0 %v141_v6 }
  0x26   :  { %509 = vmatpush.msrb.mxu3 %v143_v4  ;;  %374 = vmatpush.msrb.mxu1 %v142_v5 }
  0x27   :  { %442 = vmatpush.msrb.mxu2 %v142_v5 }
  0x28   :  { %510 = vmatpush.msrb.mxu3 %v142_v5  ;;  %375 = vmatpush.msrb.mxu1 %v141_v6 }
  0x29   :  { %443 = vmatpush.msrb.mxu2 %v141_v6 }
  0x2a   :  { %511 = vmatpush.msrb.mxu3 %v141_v6  ;;  %644 = vmatpush.msra.mxu1 %v144_v3 }
  0x2c   :  { %645 = vmatpush.msra.mxu1 %v143_v4 }
  0x2e   :  { %646 = vmatpush.msra.mxu1 %v142_v5 }
  0x30   :  { %647 = vmatpush.msra.mxu1 %v141_v6 }
  0x99   :  { %v133_v9 = vpop.f32.mrf.mxu0 }
  0x9a   :  { %v134_v10 = vadd.f32 %v1085_v8, %v133_v9 }
  0x9c   :  { %139 = vst [vmem:[#allocation2] sm:$0xff] %v134_v10 }
  0x9e   :  { %v169_v11 = vpop.f32.mrf.mxu1 }
  0xa3   :  { %v147_v12 = vld [vmem:[#allocation2] sm:$0x3]  ;;  %v221_v39 = vld [vmem:[#allocation2 + $0x2] sm:$0x3]  ;;  %v289_v1 = vld [vmem:[#allocation2 + $0x4] sm:$0x3] }
  0xa4   :  { %v172_v13 = vadd.f32 %v169_v11, %v147_v12 }
  0xa6   :  { %770 = vtanh.f32 %v172_v13  ;;  %v741_v16 = vmul.f32 -1.442695, %v172_v13 }
  0xa8   :  { %772 = vpow2.f32 %v741_v16 }
  0xac   :  { %v771_v14 = vpop.eup %770 }
  0xad   :  { %199 = vrot.lane.b32.xlu0 %v771_v14, %s1019_s25 }
  0xae   :  { %v773_v17 = vpop.eup %772 }
  0xaf   :  { %v176_v18 = vadd.f32 1.0, %v773_v17 }
  0xb1   :  { %774 = vrcp.f32 %v176_v18  ;;  %v188_v24 = vand.u32 2147483648, %v176_v18  ;;  %vm182_vm3 = vweird.f32 %v176_v18  ;;  %v186_v25 = vand.u32 2147483647, %v176_v18 }
  0xb3   :  { %v189_v27 = vor.u32 1.1754944e-38, %v188_v24  ;;  %vm187_vm5 = vcmp.eq.f32.partialorder %v186_v25, 8.507059e+37 }
  0xb5   :  { %194 = vrot.lane.b32.xlu0 %v146_v15, %s1020_s26 }
  0xb7   :  { %v775_v19 = vpop.eup %774 }
  0xb8   :  { %v178_v20 = vmul.f32 %v775_v19, %v176_v18  ;;  %vm183_vm2 = vweird.f32 %v775_v19 }
  0xb9   :  { %vm184_vm4 = vmor %vm182_vm3, %vm183_vm2 }
  0xba   :  { %v179_v21 = vsub.f32 1.0, %v178_v20 }
  0xbc   :  { %v180_v22 = vmul.f32 %v775_v19, %v179_v21 }
  0xbe   :  { %v181_v23 = vadd.f32 %v775_v19, %v180_v22 }
  0xc0   :  { %v185_v26 = vsel %vm184_vm4, %v775_v19, %v181_v23 }
  0xc1   :  { %v190_v29 = vsel %vm187_vm5, %v189_v27, %v185_v26 }
 0x11f   :  { %v200_v28 = vpop.permute.xlu0 %199 }
 0x120   :  { %v202_v30 = vmul.f32 %v200_v28, %v190_v29  ;;  %v357_v28 = vld [vmem:[#allocation2 + $0x6] sm:$0x3] }
 0x122   :  { %204 = vrot.lane.b32.xlu1 %v202_v30, %s1020_s26 }
 0x127   :  { %v195_v31 = vpop.permute.xlu0 %194 }
 0x128   :  { %v197_v32 = vmul.f32 %v195_v31, %v190_v29 }
 0x194   :  { %v205_v33 = vpop.permute.xlu1 %204 }
 0x195   :  { %v207_v34 = vadd.f32 %v205_v33, %v197_v32 }
 0x197   :  { %776 = vtanh.f32 %v207_v34 }
 0x19d   :  { %v777_v35 = vpop.eup %776 }
 0x19e   :  { %210 = vrot.lane.b32.xlu1 %v777_v35, %s1019_s25 }
 0x210   :  { %v211_v36 = vpop.permute.xlu1 %210 }
 0x211   :  { %v213_v37 = vmul.f32 %v211_v36, %v190_v29 }
 0x213   :  { %215 = vrot.lane.b32.xlu2 %v213_v37, %s1020_s26 }
 0x26d   :  { %v216_v38 = vpop.permute.xlu2 %215 }
 0x26e   :  { %219 = vst.msk [vmem:[#allocation12] sm:$0x3] %vm218_vm6, %v216_v38  ;;  %742 = vmatmul.msk.f32.vlgmr.msra.gmra.mxu2 %vm148_vm1, %v216_v38 }
 0x2f1   :  { %v241_v40 = vpop.f32.mrf.mxu2 }
 0x2f2   :  { %v244_v41 = vadd.f32 %v241_v40, %v221_v39 }
 0x2f4   :  { %778 = vtanh.f32 %v244_v41  ;;  %v743_v43 = vmul.f32 -1.442695, %v244_v41 }
 0x2f6   :  { %780 = vpow2.f32 %v743_v43 }
 0x2fa   :  { %v779_v42 = vpop.eup %778 }
 0x2fb   :  { %267 = vrot.lane.b32.xlu2 %v779_v42, %s1019_s25 }
 0x2fc   :  { %v781_v44 = vpop.eup %780 }
 0x2fd   :  { %v248_v45 = vadd.f32 1.0, %v781_v44 }
 0x2ff   :  { %782 = vrcp.f32 %v248_v45  ;;  %v260_v51 = vand.u32 2147483648, %v248_v45  ;;  %vm254_vm8 = vweird.f32 %v248_v45  ;;  %v258_v52 = vand.u32 2147483647, %v248_v45 }
 0x301   :  { %v261_v54 = vor.u32 1.1754944e-38, %v260_v51  ;;  %vm259_vm10 = vcmp.eq.f32.partialorder %v258_v52, 8.507059e+37  ;;  %v102_v51 = vld [vmem:[#allocation3 + $0x8] sm:$0xff] }
 0x302   :  { %739 = vmatmul.msk.f32.gmra.mxu0 %vm109_vm0, %v102_v51 }
 0x305   :  { %v783_v46 = vpop.eup %782 }
 0x306   :  { %v250_v47 = vmul.f32 %v783_v46, %v248_v45  ;;  %vm255_vm7 = vweird.f32 %v783_v46 }
 0x307   :  { %vm256_vm9 = vmor %vm254_vm8, %vm255_vm7 }
 0x308   :  { %v251_v48 = vsub.f32 1.0, %v250_v47 }
 0x30a   :  { %v252_v49 = vmul.f32 %v783_v46, %v251_v48 }
 0x30c   :  { %v253_v50 = vadd.f32 %v783_v46, %v252_v49 }
 0x30e   :  { %v257_v53 = vsel %vm256_vm9, %v783_v46, %v253_v50 }
 0x30f   :  { %v262_v56 = vsel %vm259_vm10, %v261_v54, %v257_v53 }
 0x310   :  { %v265_v58 = vmul.f32 %v262_v56, %v207_v34 }
 0x355   :  { %v268_v55 = vpop.permute.xlu2 %267 }
 0x356   :  { %v270_v57 = vmul.f32 %v268_v55, %v262_v56 }
 0x358   :  { %272 = vrot.lane.b32.xlu0 %v270_v57, %s1020_s26 }
 0x37f   :  { %v136_v54 = vpop.f32.mrf.mxu0 }
 0x380   :  { %v137_v55 = vadd.f32 %v1085_v8, %v136_v54 }
 0x382   :  { %140 = vst [vmem:[#allocation2 + $0x8] sm:$0xff] %v137_v55 }
 0x389   :  { %v425_v57 = vld [vmem:[#allocation2 + $0x8] sm:$0x3] }
 0x3ca   :  { %v273_v59 = vpop.permute.xlu0 %272 }
 0x3cb   :  { %v275_v60 = vadd.f32 %v273_v59, %v265_v58 }
 0x3cd   :  { %784 = vtanh.f32 %v275_v60 }
 0x3d3   :  { %v785_v61 = vpop.eup %784 }
 0x3d4   :  { %278 = vrot.lane.b32.xlu1 %v785_v61, %s1019_s25 }
 0x446   :  { %v279_v62 = vpop.permute.xlu1 %278 }
 0x447   :  { %v281_v63 = vmul.f32 %v279_v62, %v262_v56 }
 0x449   :  { %283 = vrot.lane.b32.xlu2 %v281_v63, %s1020_s26 }
 0x4a3   :  { %v284_v0 = vpop.permute.xlu2 %283 }
 0x4a4   :  { %287 = vst.msk [vmem:[#allocation12 + $0x2] sm:$0x3] %vm218_vm6, %v284_v0  ;;  %744 = vmatmul.msk.f32.vlgmr.msra.gmra.mxu3 %vm148_vm1, %v284_v0 }
 0x527   :  { %v309_v2 = vpop.f32.mrf.mxu3 }
 0x528   :  { %v312_v3 = vadd.f32 %v309_v2, %v289_v1 }
 0x52a   :  { %786 = vtanh.f32 %v312_v3  ;;  %v745_v5 = vmul.f32 -1.442695, %v312_v3 }
 0x52c   :  { %788 = vpow2.f32 %v745_v5 }
 0x530   :  { %v787_v4 = vpop.eup %786 }
 0x531   :  { %335 = vrot.lane.b32.xlu0 %v787_v4, %s1019_s25 }
 0x532   :  { %v789_v6 = vpop.eup %788 }
 0x533   :  { %v316_v7 = vadd.f32 1.0, %v789_v6 }
 0x535   :  { %790 = vrcp.f32 %v316_v7  ;;  %v328_v14 = vand.u32 2147483648, %v316_v7  ;;  %vm322_vm12 = vweird.f32 %v316_v7  ;;  %v326_v15 = vand.u32 2147483647, %v316_v7 }
 0x537   :  { %v329_v17 = vor.u32 1.1754944e-38, %v328_v14  ;;  %vm327_vm14 = vcmp.eq.f32.partialorder %v326_v15, 8.507059e+37 }
 0x53b   :  { %v791_v9 = vpop.eup %790 }
 0x53c   :  { %v318_v10 = vmul.f32 %v791_v9, %v316_v7  ;;  %vm323_vm11 = vweird.f32 %v791_v9 }
 0x53d   :  { %vm324_vm13 = vmor %vm322_vm12, %vm323_vm11 }
 0x53e   :  { %v319_v11 = vsub.f32 1.0, %v318_v10 }
 0x540   :  { %v320_v12 = vmul.f32 %v791_v9, %v319_v11 }
 0x542   :  { %v321_v13 = vadd.f32 %v791_v9, %v320_v12 }
 0x544   :  { %v325_v16 = vsel %vm324_vm13, %v791_v9, %v321_v13 }
 0x545   :  { %v330_v19 = vsel %vm327_vm14, %v329_v17, %v325_v16 }
 0x546   :  { %v333_v21 = vmul.f32 %v330_v19, %v275_v60 }
 0x5a3   :  { %v336_v18 = vpop.permute.xlu0 %335 }
 0x5a4   :  { %v338_v20 = vmul.f32 %v336_v18, %v330_v19 }
 0x5a6   :  { %340 = vrot.lane.b32.xlu1 %v338_v20, %s1020_s26 }
 0x618   :  { %v341_v22 = vpop.permute.xlu1 %340 }
 0x619   :  { %v343_v23 = vadd.f32 %v341_v22, %v333_v21 }
 0x61b   :  { %792 = vtanh.f32 %v343_v23 }
 0x621   :  { %v793_v24 = vpop.eup %792 }
 0x622   :  { %346 = vrot.lane.b32.xlu2 %v793_v24, %s1019_s25 }
 0x67c   :  { %v347_v25 = vpop.permute.xlu2 %346 }
 0x67d   :  { %v349_v26 = vmul.f32 %v347_v25, %v330_v19  ;;  %v493_v19 = vld [vmem:[#allocation2 + $0xa] sm:$0x3] }
 0x67f   :  { %351 = vrot.lane.b32.xlu0 %v349_v26, %s1020_s26 }
 0x6f1   :  { %v352_v27 = vpop.permute.xlu0 %351 }
 0x6f2   :  { %355 = vst.msk [vmem:[#allocation12 + $0x4] sm:$0x3] %vm218_vm6, %v352_v27  ;;  %746 = vmatmul.msk.f32.vlgmr.msrb.gmra.mxu1 %vm148_vm1, %v352_v27 }
 0x76f   :  { %v377_v29 = vpop.f32.mrf.mxu1 }
 0x770   :  { %v380_v30 = vadd.f32 %v377_v29, %v357_v28 }
 0x772   :  { %794 = vtanh.f32 %v380_v30  ;;  %v747_v32 = vmul.f32 -1.442695, %v380_v30 }
 0x774   :  { %796 = vpow2.f32 %v747_v32 }
 0x778   :  { %v795_v31 = vpop.eup %794 }
 0x779   :  { %403 = vrot.lane.b32.xlu1 %v795_v31, %s1019_s25 }
 0x77a   :  { %v797_v33 = vpop.eup %796 }
 0x77b   :  { %v384_v34 = vadd.f32 1.0, %v797_v33 }
 0x77d   :  { %798 = vrcp.f32 %v384_v34  ;;  %v396_v40 = vand.u32 2147483648, %v384_v34  ;;  %vm390_vm2 = vweird.f32 %v384_v34  ;;  %v394_v41 = vand.u32 2147483647, %v384_v34 }
 0x77f   :  { %v397_v43 = vor.u32 1.1754944e-38, %v396_v40  ;;  %vm395_vm4 = vcmp.eq.f32.partialorder %v394_v41, 8.507059e+37 }
 0x783   :  { %v799_v35 = vpop.eup %798 }
 0x784   :  { %v386_v36 = vmul.f32 %v799_v35, %v384_v34  ;;  %vm391_vm15 = vweird.f32 %v799_v35 }
 0x785   :  { %vm392_vm3 = vmor %vm390_vm2, %vm391_vm15 }
 0x786   :  { %v387_v37 = vsub.f32 1.0, %v386_v36 }
 0x788   :  { %v388_v38 = vmul.f32 %v799_v35, %v387_v37 }
 0x78a   :  { %v389_v39 = vadd.f32 %v799_v35, %v388_v38 }
 0x78c   :  { %v393_v42 = vsel %vm392_vm3, %v799_v35, %v389_v39 }
 0x78d   :  { %v398_v45 = vsel %vm395_vm4, %v397_v43, %v393_v42 }
 0x78e   :  { %v401_v47 = vmul.f32 %v398_v45, %v343_v23 }
 0x7eb   :  { %v404_v44 = vpop.permute.xlu1 %403 }
 0x7ec   :  { %v406_v46 = vmul.f32 %v404_v44, %v398_v45 }
 0x7ee   :  { %408 = vrot.lane.b32.xlu2 %v406_v46, %s1020_s26 }
 0x848   :  { %v409_v48 = vpop.permute.xlu2 %408 }
 0x849   :  { %v411_v49 = vadd.f32 %v409_v48, %v401_v47 }
 0x84b   :  { %800 = vtanh.f32 %v411_v49 }
 0x851   :  { %v801_v50 = vpop.eup %800 }
 0x852   :  { %414 = vrot.lane.b32.xlu0 %v801_v50, %s1019_s25 }
 0x8c4   :  { %v415_v52 = vpop.permute.xlu0 %414 }
 0x8c5   :  { %v417_v53 = vmul.f32 %v415_v52, %v398_v45  ;;  %v561_v45 = vld [vmem:[#allocation2 + $0xc] sm:$0x3] }
 0x8c7   :  { %419 = vrot.lane.b32.xlu1 %v417_v53, %s1020_s26 }
 0x939   :  { %v420_v56 = vpop.permute.xlu1 %419 }
 0x93a   :  { %423 = vst.msk [vmem:[#allocation12 + $0x6] sm:$0x3] %vm218_vm6, %v420_v56  ;;  %748 = vmatmul.msk.f32.vlgmr.msrb.gmra.mxu2 %vm148_vm1, %v420_v56 }
 0x9bd   :  { %v445_v58 = vpop.f32.mrf.mxu2 }
 0x9be   :  { %v448_v59 = vadd.f32 %v445_v58, %v425_v57 }
 0x9c0   :  { %802 = vtanh.f32 %v448_v59  ;;  %v749_v61 = vmul.f32 -1.442695, %v448_v59 }
 0x9c2   :  { %804 = vpow2.f32 %v749_v61 }
 0x9c6   :  { %v803_v60 = vpop.eup %802 }
 0x9c7   :  { %471 = vrot.lane.b32.xlu2 %v803_v60, %s1019_s25 }
 0x9c8   :  { %v805_v62 = vpop.eup %804 }
 0x9c9   :  { %v452_v63 = vadd.f32 1.0, %v805_v62 }
 0x9cb   :  { %806 = vrcp.f32 %v452_v63  ;;  %v464_v4 = vand.u32 2147483648, %v452_v63  ;;  %vm458_vm5 = vweird.f32 %v452_v63  ;;  %v462_v5 = vand.u32 2147483647, %v452_v63 }
 0x9cd   :  { %v465_v7 = vor.u32 1.1754944e-38, %v464_v4  ;;  %vm463_vm8 = vcmp.eq.f32.partialorder %v462_v5, 8.507059e+37 }
 0x9d1   :  { %v807_v0 = vpop.eup %806 }
 0x9d2   :  { %v454_v8 = vmul.f32 %v807_v0, %v452_v63  ;;  %vm459_vm0 = vweird.f32 %v807_v0 }
 0x9d3   :  { %vm460_vm7 = vmor %vm458_vm5, %vm459_vm0 }
 0x9d4   :  { %v455_v1 = vsub.f32 1.0, %v454_v8 }
 0x9d6   :  { %v456_v2 = vmul.f32 %v807_v0, %v455_v1 }
 0x9d8   :  { %v457_v3 = vadd.f32 %v807_v0, %v456_v2 }
 0x9da   :  { %v461_v6 = vsel %vm460_vm7, %v807_v0, %v457_v3 }
 0x9db   :  { %v466_v10 = vsel %vm463_vm8, %v465_v7, %v461_v6  ;;  %v629_v6 = vld [vmem:[#allocation2 + $0xe] sm:$0x3] }
 0x9dc   :  { %v469_v12 = vmul.f32 %v466_v10, %v411_v49 }
 0xa21   :  { %v472_v9 = vpop.permute.xlu2 %471 }
 0xa22   :  { %v474_v11 = vmul.f32 %v472_v9, %v466_v10 }
 0xa24   :  { %476 = vrot.lane.b32.xlu0 %v474_v11, %s1020_s26 }
 0xa96   :  { %v477_v13 = vpop.permute.xlu0 %476 }
 0xa97   :  { %v479_v14 = vadd.f32 %v477_v13, %v469_v12 }
 0xa99   :  { %808 = vtanh.f32 %v479_v14 }
 0xa9f   :  { %v809_v15 = vpop.eup %808 }
 0xaa0   :  { %482 = vrot.lane.b32.xlu1 %v809_v15, %s1019_s25 }
 0xb12   :  { %v483_v16 = vpop.permute.xlu1 %482 }
 0xb13   :  { %v485_v17 = vmul.f32 %v483_v16, %v466_v10 }
 0xb15   :  { %487 = vrot.lane.b32.xlu2 %v485_v17, %s1020_s26 }
 0xb6f   :  { %v488_v18 = vpop.permute.xlu2 %487 }
 0xb70   :  { %491 = vst.msk [vmem:[#allocation12 + $0x8] sm:$0x3] %vm218_vm6, %v488_v18  ;;  %750 = vmatmul.msk.f32.vlgmr.msrb.gmra.mxu3 %vm148_vm1, %v488_v18 }
 0xbf3   :  { %v513_v20 = vpop.f32.mrf.mxu3 }
 0xbf4   :  { %v516_v21 = vadd.f32 %v513_v20, %v493_v19 }
 0xbf6   :  { %810 = vtanh.f32 %v516_v21  ;;  %v751_v23 = vmul.f32 -1.442695, %v516_v21 }
 0xbf8   :  { %812 = vpow2.f32 %v751_v23 }
 0xbfc   :  { %v811_v22 = vpop.eup %810 }
 0xbfd   :  { %539 = vrot.lane.b32.xlu0 %v811_v22, %s1019_s25 }
 0xbfe   :  { %v813_v24 = vpop.eup %812 }
 0xbff   :  { %v520_v25 = vadd.f32 1.0, %v813_v24 }
 0xc01   :  { %814 = vrcp.f32 %v520_v25  ;;  %v532_v31 = vand.u32 2147483648, %v520_v25  ;;  %vm526_vm10 = vweird.f32 %v520_v25  ;;  %v530_v32 = vand.u32 2147483647, %v520_v25 }
 0xc03   :  { %v533_v34 = vor.u32 1.1754944e-38, %v532_v31  ;;  %vm531_vm12 = vcmp.eq.f32.partialorder %v530_v32, 8.507059e+37 }
 0xc07   :  { %v815_v26 = vpop.eup %814 }
 0xc08   :  { %v522_v27 = vmul.f32 %v815_v26, %v520_v25  ;;  %vm527_vm9 = vweird.f32 %v815_v26 }
 0xc09   :  { %vm528_vm11 = vmor %vm526_vm10, %vm527_vm9 }
 0xc0a   :  { %v523_v28 = vsub.f32 1.0, %v522_v27 }
 0xc0c   :  { %v524_v29 = vmul.f32 %v815_v26, %v523_v28 }
 0xc0e   :  { %v525_v30 = vadd.f32 %v815_v26, %v524_v29 }
 0xc10   :  { %v529_v33 = vsel %vm528_vm11, %v815_v26, %v525_v30 }
 0xc11   :  { %v534_v36 = vsel %vm531_vm12, %v533_v34, %v529_v33 }
 0xc12   :  { %v537_v38 = vmul.f32 %v534_v36, %v479_v14 }
 0xc6f   :  { %v540_v35 = vpop.permute.xlu0 %539 }
 0xc70   :  { %v542_v37 = vmul.f32 %v540_v35, %v534_v36 }
 0xc72   :  { %544 = vrot.lane.b32.xlu1 %v542_v37, %s1020_s26 }
 0xce4   :  { %v545_v39 = vpop.permute.xlu1 %544 }
 0xce5   :  { %v547_v40 = vadd.f32 %v545_v39, %v537_v38 }
 0xce7   :  { %816 = vtanh.f32 %v547_v40 }
 0xced   :  { %v817_v41 = vpop.eup %816 }
 0xcee   :  { %550 = vrot.lane.b32.xlu2 %v817_v41, %s1019_s25 }
 0xd48   :  { %v551_v42 = vpop.permute.xlu2 %550 }
 0xd49   :  { %v553_v43 = vmul.f32 %v551_v42, %v534_v36 }
 0xd4b   :  { %555 = vrot.lane.b32.xlu0 %v553_v43, %s1020_s26 }
 0xdbd   :  { %v556_v44 = vpop.permute.xlu0 %555 }
 0xdbe   :  { %559 = vst.msk [vmem:[#allocation12 + $0xa] sm:$0x3] %vm218_vm6, %v556_v44  ;;  %752 = vmatmul.msk.f32.vlgmr.msrb.gmra.mxu0 %vm148_vm1, %v556_v44 }
 0xe3b   :  { %v581_v46 = vpop.f32.mrf.mxu0 }
 0xe3c   :  { %v584_v47 = vadd.f32 %v581_v46, %v561_v45 }
 0xe3e   :  { %818 = vtanh.f32 %v584_v47  ;;  %v753_v49 = vmul.f32 -1.442695, %v584_v47 }
 0xe40   :  { %820 = vpow2.f32 %v753_v49 }
 0xe44   :  { %v819_v48 = vpop.eup %818 }
 0xe45   :  { %607 = vrot.lane.b32.xlu1 %v819_v48, %s1019_s25 }
 0xe46   :  { %v821_v50 = vpop.eup %820 }
 0xe47   :  { %v588_v51 = vadd.f32 1.0, %v821_v50 }
 0xe49   :  { %822 = vrcp.f32 %v588_v51  ;;  %v600_v57 = vand.u32 2147483648, %v588_v51  ;;  %vm594_vm14 = vweird.f32 %v588_v51  ;;  %v598_v58 = vand.u32 2147483647, %v588_v51 }
 0xe4b   :  { %v601_v60 = vor.u32 1.1754944e-38, %v600_v57  ;;  %vm599_vm2 = vcmp.eq.f32.partialorder %v598_v58, 8.507059e+37 }
 0xe4f   :  { %v823_v52 = vpop.eup %822 }
 0xe50   :  { %v590_v53 = vmul.f32 %v823_v52, %v588_v51  ;;  %vm595_vm13 = vweird.f32 %v823_v52 }
 0xe51   :  { %vm596_vm15 = vmor %vm594_vm14, %vm595_vm13 }
 0xe52   :  { %v591_v54 = vsub.f32 1.0, %v590_v53 }
 0xe54   :  { %v592_v55 = vmul.f32 %v823_v52, %v591_v54 }
 0xe56   :  { %v593_v56 = vadd.f32 %v823_v52, %v592_v55 }
 0xe58   :  { %v597_v59 = vsel %vm596_vm15, %v823_v52, %v593_v56 }
 0xe59   :  { %v602_v62 = vsel %vm599_vm2, %v601_v60, %v597_v59 }
 0xe5a   :  { %v605_v0 = vmul.f32 %v602_v62, %v547_v40 }
 0xeb7   :  { %v608_v61 = vpop.permute.xlu1 %607 }
 0xeb8   :  { %v610_v63 = vmul.f32 %v608_v61, %v602_v62 }
 0xeba   :  { %612 = vrot.lane.b32.xlu2 %v610_v63, %s1020_s26 }
 0xf14   :  { %v613_v8 = vpop.permute.xlu2 %612 }
 0xf15   :  { %v615_v1 = vadd.f32 %v613_v8, %v605_v0 }
 0xf17   :  { %824 = vtanh.f32 %v615_v1 }
 0xf1d   :  { %v825_v2 = vpop.eup %824 }
 0xf1e   :  { %618 = vrot.lane.b32.xlu0 %v825_v2, %s1019_s25 }
 0xf90   :  { %v619_v3 = vpop.permute.xlu0 %618 }
 0xf91   :  { %v621_v4 = vmul.f32 %v619_v3, %v602_v62 }
 0xf93   :  { %623 = vrot.lane.b32.xlu1 %v621_v4, %s1020_s26 }
0x1005   :  { %v624_v5 = vpop.permute.xlu1 %623 }
0x1006   :  { %627 = vst.msk [vmem:[#allocation12 + $0xc] sm:$0x3] %vm218_vm6, %v624_v5  ;;  %754 = vmatmul.msk.f32.vlgmr.msra.gmra.mxu1 %vm148_vm1, %v624_v5 }
0x1083   :  { %v649_v7 = vpop.f32.mrf.mxu1 }
0x1084   :  { %v652_v9 = vadd.f32 %v649_v7, %v629_v6 }
0x1086   :  { %826 = vtanh.f32 %v652_v9  ;;  %v755_v11 = vmul.f32 -1.442695, %v652_v9 }
0x1088   :  { %828 = vpow2.f32 %v755_v11 }
0x108c   :  { %v827_v10 = vpop.eup %826 }
0x108d   :  { %675 = vrot.lane.b32.xlu2 %v827_v10, %s1019_s25 }
0x108e   :  { %v829_v12 = vpop.eup %828 }
0x108f   :  { %v656_v13 = vadd.f32 1.0, %v829_v12 }
0x1091   :  { %830 = vrcp.f32 %v656_v13  ;;  %v668_v19 = vand.u32 2147483648, %v656_v13  ;;  %vm662_vm1 = vweird.f32 %v656_v13  ;;  %v666_v20 = vand.u32 2147483647, %v656_v13 }
0x1093   :  { %v669_v22 = vor.u32 1.1754944e-38, %v668_v19  ;;  %vm667_vm0 = vcmp.eq.f32.partialorder %v666_v20, 8.507059e+37 }
0x1097   :  { %v831_v14 = vpop.eup %830 }
0x1098   :  { %v658_v15 = vmul.f32 %v831_v14, %v656_v13  ;;  %vm663_vm3 = vweird.f32 %v831_v14 }
0x1099   :  { %vm664_vm4 = vmor %vm662_vm1, %vm663_vm3 }
0x109a   :  { %v659_v16 = vsub.f32 1.0, %v658_v15 }
0x109c   :  { %v660_v17 = vmul.f32 %v831_v14, %v659_v16 }
0x109e   :  { %v661_v18 = vadd.f32 %v831_v14, %v660_v17 }
0x10a0   :  { %v665_v21 = vsel %vm664_vm4, %v831_v14, %v661_v18 }
0x10a1   :  { %v670_v24 = vsel %vm667_vm0, %v669_v22, %v665_v21 }
0x10a2   :  { %v673_v26 = vmul.f32 %v670_v24, %v615_v1 }
0x10e7   :  { %v676_v23 = vpop.permute.xlu2 %675 }
0x10e8   :  { %v678_v25 = vmul.f32 %v676_v23, %v670_v24 }
0x10ea   :  { %680 = vrot.lane.b32.xlu0 %v678_v25, %s1020_s26 }
0x115c   :  { %v681_v27 = vpop.permute.xlu0 %680 }
0x115d   :  { %v683_v28 = vadd.f32 %v681_v27, %v673_v26 }
0x115f   :  { %832 = vtanh.f32 %v683_v28  ;;  %697 = vrot.lane.b32.xlu0 %v683_v28, %s1021_s5 }
0x1165   :  { %v833_v29 = vpop.eup %832 }
0x1166   :  { %686 = vrot.lane.b32.xlu1 %v833_v29, %s1019_s25 }
0x11d1   :  { %v698_v30 = vpop.permute.xlu0 %697 }
0x11d2   :  { %700 = vst.msk [vmem:[#allocation13] sm:$0x3] %vm218_vm6, %v698_v30 }
0x11d3   :  { %724 = dma.vmem_to_hbm [thread:$0]  %s720_s28, 32, %s722_s8, [#allocation14]  }
0x11d8   :  { %v687_v31 = vpop.permute.xlu1 %686 }
0x11d9   :  { %v689_v32 = vmul.f32 %v687_v31, %v670_v24 }
0x11db   :  { %691 = vrot.lane.b32.xlu2 %v689_v32, %s1020_s26 }
0x1235   :  { %v692_v33 = vpop.permute.xlu2 %691 }
0x1236   :  { %695 = vst.msk [vmem:[#allocation12 + $0xe] sm:$0x3] %vm218_vm6, %v692_v33 }
0x1237   :  { %713 = dma.vmem_to_hbm [thread:$0]  %s706_s10, 256, %s708_s13, [#allocation5], %s1020_s26, %s1020_s26, %s1024_s7  }
0x1238   :  { %1008 = dma.done.wait [#allocation5], 256  }
0x1239   :  { %1009 = vsyncadd [#allocation5], 4294967040 }
0x123a   :  { %1010 = dma.done.wait [#allocation14], 32  }
0x123b   :  { %1011 = vsyncadd [#allocation14], 4294967264 }
0x123c   :  { %733 = vsyncpa [#allocation4], 1 }
0x123d   :  { %734 = vsyncpa [#allocation7], 1 }
0x123e   :  { %735 = vsyncpa [#allocation10], 1 }
0x123f   :  { %736 = vsyncpa [#allocation5], 1 }
0x1240   :  { %737 = vsyncpa [#allocation14], 1 }

</bundles_post_ra>
